<compile_context>
chip_gen: v7x
topology: tpu7x:2x2x1
jax: 0.10.0
libtpu: 0.0.40
codegen_flags: <defaults>
</compile_context>

<pallas_src>
import numpy as np
import jax
import jax.numpy as jnp
from jax.experimental import pallas as pl
from jax.experimental.pallas import tpu as pltpu

# ---------------- model configuration ----------------
NF = 3
DO_FDOTU = True
NHIDDEN = 2
WIDTH = 32
NX = NF * (1 + 2 * NF) + (2 * NF if DO_FDOTU else 0)   # 27
NY = (2 * NF) ** 2                                      # 36


def _round_up(n, m):
    return ((n + m - 1) // m) * m


# ---------------- Pallas kernel (feature-major: batch on the lane axis) ----------------
def asym_mlp_kernel(x_ref, w0_ref, b0_ref, w1_ref, b1_ref,
                    w2_ref, b2_ref, w3_ref, b3_ref, out_ref):
    # x_ref: (NX, TB); w*_ref: (out, in) transposed weights; b*_ref: (out, 1) f32.
    # hidden layer 0: Linear(NX, W) + ReLU   (f32 accumulation on the MXU)
    h = jnp.dot(w0_ref[...], x_ref[...], preferred_element_type=jnp.float32) + b0_ref[...]
    h = jnp.maximum(h, 0.0)
    # hidden layer 1: Linear(W, W) + ReLU
    h = jnp.dot(w1_ref[...], h.astype(w1_ref.dtype),
                preferred_element_type=jnp.float32) + b1_ref[...]
    h = jnp.maximum(h, 0.0)
    # hidden layer 2: Linear(W, W) + ReLU
    h = jnp.dot(w2_ref[...], h.astype(w2_ref.dtype),
                preferred_element_type=jnp.float32) + b2_ref[...]
    h = jnp.maximum(h, 0.0)
    # output layer: Linear(W, Ny) with the trace-fix affine map pre-folded into w3/b3
    y = jnp.dot(w3_ref[...], h.astype(w3_ref.dtype),
                preferred_element_type=jnp.float32) + b3_ref[...]
    out_ref[...] = y.astype(out_ref.dtype)


def asymptotic_nn_forward(x, kernel_params, *, block_batch=8192,
                          compute_dtype=jnp.float32, core_parallel=False):
    """x: (B, NX) float32 (PyTorch layout) or (NX, B) feature-major.
    Returns (B, 2, NF, 2, NF); dtype f32 for the default path, bf16 for the bf16 path."""
    w0t, b0, w1t, b1, w2t, b2, w3t, b3 = kernel_params
    compute_dtype = np.dtype(compute_dtype)
    out_dtype = jnp.float32 if compute_dtype == np.dtype(jnp.float32) else compute_dtype

    if x.ndim != 2:
        raise ValueError("x must be rank-2")
    if x.shape[1] == NX:                      # (B, NX): one fused transpose+cast pass
        B = x.shape[0]
        xt = x.T.astype(compute_dtype)        # (NX, B)
    elif x.shape[0] == NX:                    # already feature-major: no extra pass
        B = x.shape[1]
        xt = x.astype(compute_dtype)
    else:
        raise ValueError(f"x shape {x.shape} incompatible with NX={NX}")

    # Lane tile: multiple of 128 and <= B; small batches use a single full-extent block
    # (exempt from the 128-lane rule).  Ragged trailing blocks are masked by Pallas,
    # so no batch padding / extra HBM passes are needed.
    block_batch = max(128, _round_up(block_batch, 128))
    if B >= 128:
        TB = min(block_batch, (B // 128) * 128)
    else:
        TB = B
    grid = (pl.cdiv(B, TB),)

    # matmul operands in compute_dtype (f32 or bf16); biases / accumulation stay f32
    w0c, w1c, w2c, w3c = (w.astype(compute_dtype) for w in (w0t, w1t, w2t, w3t))

    # Explicit scoped-VMEM budget: clears v5e's 16 MiB default, stays well under
    # v7x's 64 MiB physical VMEM.
    in_b = compute_dtype.itemsize
    out_b = np.dtype(out_dtype).itemsize
    vmem_need = 2 * TB * (NX * in_b + NY * out_b) + 256 * 1024
    vmem_limit = int(min(max(32 << 20, 2 * vmem_need), 48 << 20))

    const = lambda i: (0, 0)   # weights/biases resident in VMEM across the whole grid
    grid_spec = pltpu.PrefetchScalarGridSpec(
        num_scalar_prefetch=0,
        grid=grid,
        in_specs=[
            pl.BlockSpec((NX, TB), lambda i: (0, i)),
            pl.BlockSpec(w0c.shape, const), pl.BlockSpec(b0.shape, const),
            pl.BlockSpec(w1c.shape, const), pl.BlockSpec(b1.shape, const),
            pl.BlockSpec(w2c.shape, const), pl.BlockSpec(b2.shape, const),
            pl.BlockSpec(w3c.shape, const), pl.BlockSpec(b3.shape, const),
        ],
        out_specs=pl.BlockSpec((NY, TB), lambda i: (0, i)),
    )
    # On v7x set core_parallel=True so both TensorCores share the batch grid axis;
    # plain "parallel" is the safe default for single-TC v5e/v6e.
    dims = (pltpu.CORE_PARALLEL,) if core_parallel else ("parallel",)

    yt = pl.pallas_call(
        asym_mlp_kernel,
        out_shape=jax.ShapeDtypeStruct((NY, B), out_dtype),
        grid_spec=grid_spec,
        compiler_params=pltpu.CompilerParams(
            dimension_semantics=dims,
            vmem_limit_bytes=vmem_limit),
    )(xt, w0c, b0, w1c, b1, w2c, b2, w3c, b3)

    # Layout plumbing back to the module's (B, 2, NF, 2, NF) output convention.
    return yt.T.reshape(B, 2, NF, 2, NF)


# ---------------- parameter construction (deterministic) ----------------
def kaiming_normal(key, fan_in, fan_out):
    # torch.nn.init.kaiming_normal_ default: std = sqrt(2 / fan_in)
    std = np.sqrt(2.0 / fan_in)
    # stored (in, out) so the reference forward is x @ W
    return jax.random.normal(key, (fan_in, fan_out), dtype=jnp.float32) * std


def build_raw_params(key):
    k0, k1, k2, k3 = jax.random.split(key, 4)
    w0 = kaiming_normal(k0, NX, WIDTH)
    w1 = kaiming_normal(k1, WIDTH, WIDTH)
    w2 = kaiming_normal(k2, WIDTH, WIDTH)
    w3 = kaiming_normal(k3, WIDTH, NY)
    b0 = jnp.zeros((1, WIDTH), jnp.float32)
    b1 = jnp.zeros((1, WIDTH), jnp.float32)
    b2 = jnp.zeros((1, WIDTH), jnp.float32)
    b3 = jnp.zeros((1, NY), jnp.float32)
    return (w0, b0, w1, b1, w2, b2, w3, b3)


def build_trace_fix():
    # y_new_flat = y_flat @ T + c  encodes  y + (delta_ij - sum_a y[i,a,j,b]) / NF
    # with flat index ((i*NF + a)*2 + j)*NF + b  <->  y[n, i, a, j, b]
    def flat(i, a, j, b):
        return ((i * NF + a) * 2 + j) * NF + b

    T = np.zeros((NY, NY), np.float32)
    c = np.zeros((NY,), np.float32)
    for i in range(2):
        for a in range(NF):
            for j in range(2):
                for b in range(NF):
                    col = flat(i, a, j, b)
                    T[col, col] += 1.0
                    for ap in range(NF):
                        T[flat(i, ap, j, b), col] -= 1.0 / NF
                    c[col] = (1.0 if i == j else 0.0) / NF
    return jnp.asarray(T), jnp.asarray(c).reshape(1, NY)


def prepare_kernel_params(raw):
    """Fold the trace-fix affine map into the last Linear, then transpose everything
    into the (out_features, in_features) / (out_features, 1) layout used by the kernel."""
    w0, b0, w1, b1, w2, b2, w3, b3 = raw
    T, c = build_trace_fix()
    w3f = w3 @ T                 # (WIDTH, NY)
    b3f = b3 @ T + c             # (1, NY)
    return (w0.T, b0.reshape(WIDTH, 1),
            w1.T, b1.reshape(WIDTH, 1),
            w2.T, b2.reshape(WIDTH, 1),
            w3f.T, b3f.reshape(NY, 1))


# ---------------- pure-JAX reference (mirrors the PyTorch forward) ----------------
def reference_forward(x, raw):
    (w0, b0, w1, b1, w2, b2, w3, b3) = raw
    h = jnp.maximum(x @ w0 + b0, 0.0)
    h = jnp.maximum(h @ w1 + b1, 0.0)
    h = jnp.maximum(h @ w2 + b2, 0.0)
    y = (h @ w3 + b3).reshape(x.shape[0], 2, NF, 2, NF)
    deltaij = jnp.eye(2, dtype=jnp.float32)[None, :, None, :, None]
    yflavorsum = jnp.sum(y, axis=2)[:, :, None, :, :]
    return y + (deltaij - yflavorsum) / NF


if __name__ == "__main__":
    key = jax.random.PRNGKey(0)
    kx, kp, kx2 = jax.random.split(key, 3)

    raw = build_raw_params(kp)
    kparams = prepare_kernel_params(raw)

    # Small batch: single full-extent block, B deliberately not a multiple of 8/128.
    B = 13
    x = jax.random.normal(kx, (B, NX), dtype=jnp.float32)
    y = jax.block_until_ready(asymptotic_nn_forward(x, kparams))
    y_ref = reference_forward(x, raw)
    assert y.shape == (B, 2, NF, 2, NF)
    np.testing.assert_allclose(np.asarray(y), np.asarray(y_ref), rtol=1e-5, atol=1e-5)

    # Tiled batch with a ragged (masked) trailing block: TB=256, grid=2 covers 300 rows.
    B2 = 300
    x2 = jax.random.normal(kx2, (B2, NX), dtype=jnp.float32)
    y2 = jax.block_until_ready(asymptotic_nn_forward(x2, kparams))
    np.testing.assert_allclose(np.asarray(y2), np.asarray(reference_forward(x2, raw)),
                               rtol=1e-5, atol=1e-5)

    # bf16 throughput path: bf16 DMA'd tensors (input AND output), f32 MXU accumulation.
    y_bf16 = jax.block_until_ready(
        asymptotic_nn_forward(x, kparams, compute_dtype=jnp.bfloat16))
    np.testing.assert_allclose(np.asarray(y_bf16.astype(jnp.float32)), np.asarray(y_ref),
                               rtol=1e-1, atol=1e-1)

    print("KERNEL_OK")
</pallas_src>

<mosaic_0001>
module attributes {stable_mosaic.version = 11 : i64} {
  func.func @asym_mlp_kernel(%arg0: i32, %arg1: memref<27x13xf32, #tpu.memory_space<vmem>>, %arg2: memref<32x27xf32, #tpu.memory_space<vmem>>, %arg3: memref<32x1xf32, #tpu.memory_space<vmem>>, %arg4: memref<32x32xf32, #tpu.memory_space<vmem>>, %arg5: memref<32x1xf32, #tpu.memory_space<vmem>>, %arg6: memref<32x32xf32, #tpu.memory_space<vmem>>, %arg7: memref<32x1xf32, #tpu.memory_space<vmem>>, %arg8: memref<36x32xf32, #tpu.memory_space<vmem>>, %arg9: memref<36x1xf32, #tpu.memory_space<vmem>>, %arg10: memref<36x13xf32, #tpu.memory_space<vmem>>) attributes {dimension_semantics = [#tpu.dimension_semantics<parallel>], iteration_bounds = array<i64: 1>, scalar_prefetch = 0 : i64, scratch_operands = 0 : i64, tpu.core_type = #tpu.core_type<tc>, window_params = [{transform_indices = @transform_0, window_bounds = array<i64: 27, 13>}, {pipeline_mode = #tpu.pipeline_mode<synchronous>, transform_indices = @transform_1, window_bounds = array<i64: 32, 27>}, {pipeline_mode = #tpu.pipeline_mode<synchronous>, transform_indices = @transform_2, window_bounds = array<i64: 32, 1>}, {pipeline_mode = #tpu.pipeline_mode<synchronous>, transform_indices = @transform_3, window_bounds = array<i64: 32, 32>}, {pipeline_mode = #tpu.pipeline_mode<synchronous>, transform_indices = @transform_4, window_bounds = array<i64: 32, 1>}, {pipeline_mode = #tpu.pipeline_mode<synchronous>, transform_indices = @transform_5, window_bounds = array<i64: 32, 32>}, {pipeline_mode = #tpu.pipeline_mode<synchronous>, transform_indices = @transform_6, window_bounds = array<i64: 32, 1>}, {pipeline_mode = #tpu.pipeline_mode<synchronous>, transform_indices = @transform_7, window_bounds = array<i64: 36, 32>}, {pipeline_mode = #tpu.pipeline_mode<synchronous>, transform_indices = @transform_8, window_bounds = array<i64: 36, 1>}, {transform_indices = @transform_9, window_bounds = array<i64: 36, 13>}]} {
    %c0 = arith.constant 0 : index
    %c0_0 = arith.constant 0 : index
    %0 = vector.load %arg2[%c0, %c0_0] : memref<32x27xf32, #tpu.memory_space<vmem>>, vector<32x27xf32>
    %c0_1 = arith.constant 0 : index
    %c0_2 = arith.constant 0 : index
    %1 = vector.load %arg1[%c0_1, %c0_2] : memref<27x13xf32, #tpu.memory_space<vmem>>, vector<27x13xf32>
    %cst = arith.constant dense<0.000000e+00> : vector<32x13xf32>
    %2 = tpu.matmul %0, %1, %cst {dimension_numbers = #tpu.dot_dimension_numbers<[1], [0], [0], [1], [0, 0, 1, 1], [], []>} : vector<32x27xf32>, vector<27x13xf32>, vector<32x13xf32> -> vector<32x13xf32>
    %c0_3 = arith.constant 0 : index
    %c0_4 = arith.constant 0 : index
    %3 = vector.load %arg3[%c0_3, %c0_4] : memref<32x1xf32, #tpu.memory_space<vmem>>, vector<32x1xf32>
    %4 = vector.broadcast %3 : vector<32x1xf32> to vector<32x13xf32>
    %5 = arith.addf %2, %4 : vector<32x13xf32>
    %cst_5 = arith.constant 0.000000e+00 : f32
    %6 = vector.broadcast %cst_5 : f32 to vector<32x13xf32>
    %7 = arith.maximumf %5, %6 : vector<32x13xf32>
    %c0_6 = arith.constant 0 : index
    %c0_7 = arith.constant 0 : index
    %8 = vector.load %arg4[%c0_6, %c0_7] : memref<32x32xf32, #tpu.memory_space<vmem>>, vector<32x32xf32>
    %cst_8 = arith.constant dense<0.000000e+00> : vector<32x13xf32>
    %9 = tpu.matmul %8, %7, %cst_8 {dimension_numbers = #tpu.dot_dimension_numbers<[1], [0], [0], [1], [0, 0, 1, 1], [], []>} : vector<32x32xf32>, vector<32x13xf32>, vector<32x13xf32> -> vector<32x13xf32>
    %c0_9 = arith.constant 0 : index
    %c0_10 = arith.constant 0 : index
    %10 = vector.load %arg5[%c0_9, %c0_10] : memref<32x1xf32, #tpu.memory_space<vmem>>, vector<32x1xf32>
    %11 = vector.broadcast %10 : vector<32x1xf32> to vector<32x13xf32>
    %12 = arith.addf %9, %11 : vector<32x13xf32>
    %cst_11 = arith.constant 0.000000e+00 : f32
    %13 = vector.broadcast %cst_11 : f32 to vector<32x13xf32>
    %14 = arith.maximumf %12, %13 : vector<32x13xf32>
    %c0_12 = arith.constant 0 : index
    %c0_13 = arith.constant 0 : index
    %15 = vector.load %arg6[%c0_12, %c0_13] : memref<32x32xf32, #tpu.memory_space<vmem>>, vector<32x32xf32>
    %cst_14 = arith.constant dense<0.000000e+00> : vector<32x13xf32>
    %16 = tpu.matmul %15, %14, %cst_14 {dimension_numbers = #tpu.dot_dimension_numbers<[1], [0], [0], [1], [0, 0, 1, 1], [], []>} : vector<32x32xf32>, vector<32x13xf32>, vector<32x13xf32> -> vector<32x13xf32>
    %c0_15 = arith.constant 0 : index
    %c0_16 = arith.constant 0 : index
    %17 = vector.load %arg7[%c0_15, %c0_16] : memref<32x1xf32, #tpu.memory_space<vmem>>, vector<32x1xf32>
    %18 = vector.broadcast %17 : vector<32x1xf32> to vector<32x13xf32>
    %19 = arith.addf %16, %18 : vector<32x13xf32>
    %cst_17 = arith.constant 0.000000e+00 : f32
    %20 = vector.broadcast %cst_17 : f32 to vector<32x13xf32>
    %21 = arith.maximumf %19, %20 : vector<32x13xf32>
    %c0_18 = arith.constant 0 : index
    %c0_19 = arith.constant 0 : index
    %22 = vector.load %arg8[%c0_18, %c0_19] : memref<36x32xf32, #tpu.memory_space<vmem>>, vector<36x32xf32>
    %cst_20 = arith.constant dense<0.000000e+00> : vector<36x13xf32>
    %23 = tpu.matmul %22, %21, %cst_20 {dimension_numbers = #tpu.dot_dimension_numbers<[1], [0], [0], [1], [0, 0, 1, 1], [], []>} : vector<36x32xf32>, vector<32x13xf32>, vector<36x13xf32> -> vector<36x13xf32>
    %c0_21 = arith.constant 0 : index
    %c0_22 = arith.constant 0 : index
    %24 = vector.load %arg9[%c0_21, %c0_22] : memref<36x1xf32, #tpu.memory_space<vmem>>, vector<36x1xf32>
    %25 = vector.broadcast %24 : vector<36x1xf32> to vector<36x13xf32>
    %26 = arith.addf %23, %25 : vector<36x13xf32>
    %c0_23 = arith.constant 0 : index
    %c0_24 = arith.constant 0 : index
    %27 = vector.load %arg10[%c0_23, %c0_24] : memref<36x13xf32, #tpu.memory_space<vmem>>, vector<36x13xf32>
    tpu.vector_store %arg10[%c0_23, %c0_24], %26 {strides = array<i32>} : memref<36x13xf32, #tpu.memory_space<vmem>>, vector<36x13xf32>,
    return
  }
  func.func @transform_0(%arg0: i32) -> (i32, i32) {
    %c0_i32 = arith.constant 0 : i32
    %c0_i32_0 = arith.constant 0 : i32
    return %c0_i32, %arg0 : i32, i32
  }
  func.func @transform_1(%arg0: i32) -> (i32, i32) {
    %c0_i32 = arith.constant 0 : i32
    %c0_i32_0 = arith.constant 0 : i32
    %c0_i32_1 = arith.constant 0 : i32
    return %c0_i32, %c0_i32_0 : i32, i32
  }
  func.func @transform_2(%arg0: i32) -> (i32, i32) {
    %c0_i32 = arith.constant 0 : i32
    %c0_i32_0 = arith.constant 0 : i32
    %c0_i32_1 = arith.constant 0 : i32
    return %c0_i32, %c0_i32_0 : i32, i32
  }
  func.func @transform_3(%arg0: i32) -> (i32, i32) {
    %c0_i32 = arith.constant 0 : i32
    %c0_i32_0 = arith.constant 0 : i32
    %c0_i32_1 = arith.constant 0 : i32
    return %c0_i32, %c0_i32_0 : i32, i32
  }
  func.func @transform_4(%arg0: i32) -> (i32, i32) {
    %c0_i32 = arith.constant 0 : i32
    %c0_i32_0 = arith.constant 0 : i32
    %c0_i32_1 = arith.constant 0 : i32
    return %c0_i32, %c0_i32_0 : i32, i32
  }
  func.func @transform_5(%arg0: i32) -> (i32, i32) {
    %c0_i32 = arith.constant 0 : i32
    %c0_i32_0 = arith.constant 0 : i32
    %c0_i32_1 = arith.constant 0 : i32
    return %c0_i32, %c0_i32_0 : i32, i32
  }
  func.func @transform_6(%arg0: i32) -> (i32, i32) {
    %c0_i32 = arith.constant 0 : i32
    %c0_i32_0 = arith.constant 0 : i32
    %c0_i32_1 = arith.constant 0 : i32
    return %c0_i32, %c0_i32_0 : i32, i32
  }
  func.func @transform_7(%arg0: i32) -> (i32, i32) {
    %c0_i32 = arith.constant 0 : i32
    %c0_i32_0 = arith.constant 0 : i32
    %c0_i32_1 = arith.constant 0 : i32
    return %c0_i32, %c0_i32_0 : i32, i32
  }
  func.func @transform_8(%arg0: i32) -> (i32, i32) {
    %c0_i32 = arith.constant 0 : i32
    %c0_i32_0 = arith.constant 0 : i32
    %c0_i32_1 = arith.constant 0 : i32
    return %c0_i32, %c0_i32_0 : i32, i32
  }
  func.func @transform_9(%arg0: i32) -> (i32, i32) {
    %c0_i32 = arith.constant 0 : i32
    %c0_i32_0 = arith.constant 0 : i32
    return %c0_i32, %arg0 : i32, i32
  }
}

</mosaic_0001>

<bundles_post_ra>
// kernel: tpu_custom_call.1
= control target key start
LH: loop header
LB: loop body
LE: loop exit
PB: predicated region body
PF: predicated region fallthrough
CT: control target
= control target key end

     0   :  { %vm77_vm0 = vcmask 1042432   ;;  %vm64_vm1 = vcmask 220160   ;;  %v735_v3 = vmov 0   ;;  %vm736_vm2 = vmmov 1   ;;  %s946_s0 = inlined_call_operand.vmem [shape: f32[27,13], index: 0, kind: input, shape index: {}]   ;;  %s947_s1 = inlined_call_operand.vmem [shape: f32[32,27], index: 1, kind: input, shape index: {}]   ;;  %s948_s2 = inlined_call_operand.vmem [shape: f32[32,1], index: 2, kind: input, shape index: {}]   ;;  %s949_s4 = inlined_call_operand.vmem [shape: f32[32,1], index: 4, kind: input, shape index: {}]   ;;  %s950_s6 = inlined_call_operand.vmem [shape: f32[32,1], index: 6, kind: input, shape index: {}]   ;;  %s951_s8 = inlined_call_operand.vmem [shape: f32[36,1], index: 8, kind: input, shape index: {}]   ;;  %s952_s3 = inlined_call_operand.vmem [shape: f32[32,32], index: 3, kind: input, shape index: {}]   ;;  %s953_s5 = inlined_call_operand.vmem [shape: f32[32,32], index: 5, kind: input, shape index: {}]   ;;  %s954_s7 = inlined_call_operand.vmem [shape: f32[36,32], index: 7, kind: input, shape index: {}]   ;;  %s955_s9 = inlined_call_operand.vmem [shape: f32[36,13], index: 9, kind: output, shape index: {}]  }
   0x1   :  { %v36_v0 = vld [vmem:[%s946_s0] sm:$0xff]  ;;  %v37_v1 = vld [vmem:[%s946_s0 + $0x8] sm:$0xff]  ;;  %v38_v2 = vld [vmem:[%s946_s0 + $0x10] sm:$0xff]  ;;  %733 = vset.pattern.permute.xlu0 %v735_v3  ;;  %734 = vset.pattern.permute.xlu1 %v735_v3  ;;  %vm198_vm4 = vcmask 261120   ;;  %vm738_vm5 = vmmov 0   ;;  %vm569_vm6 = vcmask 105472  }
   0x2   :  { %v696_v4 = vpack.c.bf16 %v37_v1, %v36_v0  ;;  %v39_v5 = vld [vmem:[%s946_s0 + $0x18] sm:$0x7]  ;;  %v32_v6 = vld [vmem:[%s947_s1] sm:$0xff]  ;;  %vm701_vm3 = vmpackc.low %vm77_vm0, %vm736_vm2  ;;  %vm574_vm7 = vcmask 101376  }
   0x3   :  { %v700_v7 = vpack.c.bf16 %v39_v5, %v38_v2  ;;  %639 = vmatprep.mubr.msk.f32.mxu0 %vm64_vm1, %v32_v6  ;;  %v40_v8 = vld [vmem:[%s948_s2] sm:$0xff]  ;;  %v42_v9 = vld [vmem:[%s948_s2 + $0x10] sm:$0xff]  ;;  %v41_v10 = vld [vmem:[%s948_s2 + $0x8] sm:$0xff] }
   0x4   :  { %697 = vmatprep.subr.bf16.mxu0 %v696_v4  ;;  %46 = vperm.xlu0 %733, %v40_v8   ;;  %v43_v11 = vld [vmem:[%s948_s2 + $0x18] sm:$0xff]  ;;  %v33_v12 = vld [vmem:[%s947_s1 + $0x8] sm:$0xff]  ;;  %v34_v13 = vld [vmem:[%s947_s1 + $0x10] sm:$0xff]  ;;  %v737_v8 = vmov 0.0|0.0  }
   0x5   :  { %699 = vmatpush3.bf16.msra.mxu0 %v696_v4  ;;  %56 = vperm.xlu1 %734, %v42_v9   ;;  %v174_v14 = vld [vmem:[%s949_s4] sm:$0xff]  ;;  %v175_v15 = vld [vmem:[%s949_s4 + $0x8] sm:$0xff]  ;;  %v35_v16 = vld [vmem:[%s947_s1 + $0x18] sm:$0xff]  ;;  %v739_v9 = vmov 0.0  }
   0x6   :  { %702 = vmatprep.subr.msk.bf16.mxu0 %vm701_vm3, %v700_v7  ;;  %v176_v17 = vld [vmem:[%s949_s4 + $0x10] sm:$0xff]  ;;  %v177_v18 = vld [vmem:[%s949_s4 + $0x18] sm:$0xff]  ;;  %v304_v19 = vld [vmem:[%s950_s6] sm:$0xff]  ;;  %722 = vmatprep.subr.bf16.mxu1 %v737_v8 }
   0x7   :  { %v305_v20 = vld [vmem:[%s950_s6 + $0x8] sm:$0xff]  ;;  %v306_v21 = vld [vmem:[%s950_s6 + $0x10] sm:$0xff]  ;;  %v307_v22 = vld [vmem:[%s950_s6 + $0x18] sm:$0xff]  ;;  %681 = vmatprep.mubr.msk.f32.mxu1 %vm738_vm5, %v739_v9 }
   0x8   :  { %51 = vperm.xlu0 %733, %v41_v10   ;;  %v434_v23 = vld [vmem:[%s951_s8] sm:$0xff]  ;;  %v435_v24 = vld [vmem:[%s951_s8 + $0x8] sm:$0xff]  ;;  %v436_v25 = vld [vmem:[%s951_s8 + $0x10] sm:$0xff] }
   0x9   :  { %705 = vmatpush3.bf16.msk.msra.mxu0 %vm701_vm3, %v700_v7  ;;  %61 = vperm.xlu1 %734, %v43_v11   ;;  %v437_v26 = vld [vmem:[%s951_s8 + $0x18] sm:$0xff]  ;;  %v438_v27 = vld [vmem:[%s951_s8 + $0x20] sm:$0xf]  ;;  %v171_v47 = vld [vmem:[%s952_s3 + $0x8] sm:$0xff] }
   0xa   :  { %v170_v28 = vld [vmem:[%s952_s3] sm:$0xff]  ;;  %v172_v48 = vld [vmem:[%s952_s3 + $0x10] sm:$0xff]  ;;  %v173_v49 = vld [vmem:[%s952_s3 + $0x18] sm:$0xff] }
   0xb   :  { %v300_v50 = vld [vmem:[%s953_s5] sm:$0xff]  ;;  %v301_v5 = vld [vmem:[%s953_s5 + $0x8] sm:$0xff]  ;;  %v302_v6 = vld [vmem:[%s953_s5 + $0x10] sm:$0xff] }
   0xc   :  { %640 = vmatmul.mubr.msk.f32.vlgmr.msra.gmra.mrb[0].mxu0 %vm64_vm1, %v33_v12  ;;  %180 = vperm.xlu0 %733, %v174_v14   ;;  %v303_v7 = vld [vmem:[%s953_s5 + $0x18] sm:$0xff] }
   0xd   :  { %642 = vmatprep.mubr.msk.f32.mxu0 %vm64_vm1, %v34_v13  ;;  %185 = vperm.xlu1 %734, %v175_v15  }
  0x10   :  { %643 = vmatmul.mubr.msk.f32.gmra.mrb[2].mxu0 %vm64_vm1, %v35_v16  ;;  %190 = vperm.xlu0 %733, %v176_v17  }
  0x11   :  { %195 = vperm.xlu1 %734, %v177_v18   ;;  %653 = vmatprep.mubr.msk.f32.mxu0 %vm198_vm4, %v170_v28  ;;  %v429_v28 = vld [vmem:[%s954_s7] sm:$0xff] }
  0x14   :  { %310 = vperm.xlu0 %733, %v304_v19  }
  0x15   :  { %315 = vperm.xlu1 %734, %v305_v20  }
  0x18   :  { %320 = vperm.xlu0 %733, %v306_v21  }
  0x19   :  { %325 = vperm.xlu1 %734, %v307_v22  }
  0x1c   :  { %441 = vperm.xlu0 %733, %v434_v23  }
  0x1d   :  { %446 = vperm.xlu1 %734, %v435_v24  }
  0x20   :  { %451 = vperm.xlu0 %733, %v436_v25  }
  0x21   :  { %456 = vperm.xlu1 %734, %v437_v26  }
  0x24   :  { %461 = vperm.xlu0 %733, %v438_v27  }
  0x83   :  { %v47_v29 = vpop.permute.xlu0 %46 }
  0x84   :  { %v57_v30 = vpop.permute.xlu1 %56 }
  0x87   :  { %v52_v31 = vpop.permute.xlu0 %51 }
  0x88   :  { %v62_v37 = vpop.permute.xlu1 %61 }
  0x8b   :  { %v181_v52 = vpop.permute.xlu0 %180 }
  0x8c   :  { %v186_v51 = vpop.permute.xlu1 %185 }
  0x8f   :  { %v191_v61 = vpop.permute.xlu0 %190 }
  0x90   :  { %v196_v58 = vpop.permute.xlu1 %195 }
  0x93   :  { %v311_v11 = vpop.permute.xlu0 %310 }
  0x94   :  { %v316_v10 = vpop.permute.xlu1 %315 }
  0x97   :  { %v321_v20 = vpop.permute.xlu0 %320 }
  0x98   :  { %v326_v17 = vpop.permute.xlu1 %325 }
  0xdf   :  { %v641_v32 = vpop.f32.mrb[0].mxu0 }
  0xe0   :  { %v153_v33 = vadd.f32 %v641_v32, %v52_v31  ;;  %v147_v34 = vpop.f32.mrb[1].mxu0  ;;  %v432_v31 = vld [vmem:[%s954_s7 + $0x18] sm:$0xff]  ;;  %v433_v32 = vld [vmem:[%s954_s7 + $0x20] sm:$0xf] }
  0xe1   :  { %v148_v35 = vadd.f32 %v147_v34, %v47_v29  ;;  %v430_v29 = vld [vmem:[%s954_s7 + $0x8] sm:$0xff] }
  0xe2   :  { %v167_v36 = vmax.f32 %v153_v33, 0.0  ;;  %v442_v33 = vpop.permute.xlu0 %441 }
  0xe3   :  { %v166_v38 = vmax.f32 %v148_v35, 0.0  ;;  %v644_v39 = vpop.f32.mrb[2].mxu0 }
  0xe4   :  { %v163_v40 = vadd.f32 %v644_v39, %v62_v37  ;;  %v157_v41 = vpop.f32.mrb[3].mxu0  ;;  %v447_v37 = vpop.permute.xlu1 %446 }
  0xe5   :  { %v706_v42 = vpack.c.bf16 %v167_v36, %v166_v38  ;;  %v158_v43 = vadd.f32 %v157_v41, %v57_v30  ;;  %v431_v30 = vld [vmem:[%s954_s7 + $0x10] sm:$0xff] }
  0xe6   :  { %v169_v44 = vmax.f32 %v163_v40, 0.0  ;;  %v452_v41 = vpop.permute.xlu0 %451 }
  0xe7   :  { %v168_v45 = vmax.f32 %v158_v43, 0.0  ;;  %707 = vmatprep.subr.bf16.mxu0 %v706_v42 }
  0xe8   :  { %709 = vmatpush3.bf16.msra.mxu0 %v706_v42 }
  0xe9   :  { %v710_v46 = vpack.c.bf16 %v169_v44, %v168_v45  ;;  %v457_v45 = vpop.permute.xlu1 %456 }
  0xeb   :  { %711 = vmatprep.subr.bf16.mxu0 %v710_v46 }
  0xec   :  { %713 = vmatpush3.bf16.msra.mxu0 %v710_v46 }
  0xef   :  { %654 = vmatmul.mubr.msk.f32.vlgmr.msra.gmra.mrb[4].mxu0 %vm198_vm4, %v171_v47 }
  0xf0   :  { %656 = vmatprep.mubr.msk.f32.mxu0 %vm198_vm4, %v172_v48 }
  0xf3   :  { %657 = vmatmul.mubr.msk.f32.gmra.mrb[6].mxu0 %vm198_vm4, %v173_v49  ;;  %v462_v49 = vpop.permute.xlu0 %461 }
  0xf4   :  { %667 = vmatprep.mubr.msk.f32.mxu0 %vm198_vm4, %v300_v50 }
 0x1c2   :  { %v655_v53 = vpop.f32.mrb[4].mxu0 }
 0x1c3   :  { %v283_v54 = vadd.f32 %v655_v53, %v186_v51  ;;  %v277_v55 = vpop.f32.mrb[5].mxu0 }
 0x1c4   :  { %v278_v56 = vadd.f32 %v277_v55, %v181_v52 }
 0x1c5   :  { %v297_v57 = vmax.f32 %v283_v54, 0.0 }
 0x1c6   :  { %v296_v59 = vmax.f32 %v278_v56, 0.0  ;;  %v658_v60 = vpop.f32.mrb[6].mxu0 }
 0x1c7   :  { %v293_v62 = vadd.f32 %v658_v60, %v196_v58  ;;  %v287_v63 = vpop.f32.mrb[7].mxu0 }
 0x1c8   :  { %v714_v0 = vpack.c.bf16 %v297_v57, %v296_v59  ;;  %v288_v1 = vadd.f32 %v287_v63, %v191_v61 }
 0x1c9   :  { %v299_v2 = vmax.f32 %v293_v62, 0.0 }
 0x1ca   :  { %v298_v3 = vmax.f32 %v288_v1, 0.0  ;;  %715 = vmatprep.subr.bf16.mxu0 %v714_v0 }
 0x1cb   :  { %717 = vmatpush3.bf16.msra.mxu0 %v714_v0 }
 0x1cc   :  { %v718_v4 = vpack.c.bf16 %v299_v2, %v298_v3 }
 0x1ce   :  { %719 = vmatprep.subr.bf16.mxu0 %v718_v4 }
 0x1cf   :  { %721 = vmatpush3.bf16.msra.mxu0 %v718_v4 }
 0x1d2   :  { %668 = vmatmul.mubr.msk.f32.vlgmr.msra.gmra.mrb[8].mxu0 %vm198_vm4, %v301_v5 }
 0x1d3   :  { %670 = vmatprep.mubr.msk.f32.mxu0 %vm198_vm4, %v302_v6 }
 0x1d6   :  { %671 = vmatmul.mubr.msk.f32.gmra.mrb[10].mxu0 %vm198_vm4, %v303_v7 }
 0x2a5   :  { %v669_v12 = vpop.f32.mrb[8].mxu0 }
 0x2a6   :  { %v412_v13 = vadd.f32 %v669_v12, %v316_v10  ;;  %v406_v14 = vpop.f32.mrb[9].mxu0 }
 0x2a7   :  { %v407_v15 = vadd.f32 %v406_v14, %v311_v11 }
 0x2a8   :  { %v426_v16 = vmax.f32 %v412_v13, 0.0 }
 0x2a9   :  { %v425_v18 = vmax.f32 %v407_v15, 0.0  ;;  %v672_v19 = vpop.f32.mrb[10].mxu0 }
 0x2aa   :  { %v422_v21 = vadd.f32 %v672_v19, %v326_v17  ;;  %v416_v22 = vpop.f32.mrb[11].mxu0 }
 0x2ab   :  { %v417_v23 = vadd.f32 %v416_v22, %v321_v20  ;;  %v723_v24 = vpack.c.bf16 %v426_v16, %v425_v18 }
 0x2ac   :  { %v428_v25 = vmax.f32 %v422_v21, 0.0 }
 0x2ad   :  { %v427_v26 = vmax.f32 %v417_v23, 0.0  ;;  %724 = vmatpush3.bf16.msra.mxu1 %v723_v24 }
 0x2ae   :  { %725 = vmatprep.subr.bf16.mxu1 %v737_v8 }
 0x2af   :  { %v726_v27 = vpack.c.bf16 %v428_v25, %v427_v26 }
 0x2b1   :  { %727 = vmatpush3.bf16.msra.mxu1 %v726_v27 }
 0x2b4   :  { %682 = vmatmul.mubr.msk.f32.vlgmr.msra.gmra.mrb[0].mxu1 %vm198_vm4, %v429_v28 }
 0x2b5   :  { %684 = vmatprep.mubr.msk.f32.mxu1 %vm738_vm5, %v739_v9 }
 0x2b8   :  { %685 = vmatmul.mubr.msk.f32.gmra.mrb[2].mxu1 %vm198_vm4, %v430_v29 }
 0x2b9   :  { %687 = vmatprep.mubr.msk.f32.mxu1 %vm738_vm5, %v739_v9 }
 0x2bc   :  { %688 = vmatmul.mubr.msk.f32.gmra.mrb[4].mxu1 %vm198_vm4, %v431_v30 }
 0x2bd   :  { %690 = vmatprep.mubr.msk.f32.mxu1 %vm738_vm5, %v739_v9 }
 0x2c0   :  { %691 = vmatmul.mubr.msk.f32.gmra.mrb[6].mxu1 %vm198_vm4, %v432_v31 }
 0x2c1   :  { %693 = vmatprep.mubr.msk.f32.mxu1 %vm738_vm5, %v739_v9 }
 0x2c4   :  { %694 = vmatmul.mubr.msk.f32.gmra.mrb[8].mxu1 %vm198_vm4, %v433_v32 }
 0x387   :  { %v545_v34 = vpop.f32.mrb[0].mxu1 }
 0x388   :  { %v546_v35 = vadd.f32 %v545_v34, %v442_v33  ;;  %v683_v36 = vpop.f32.mrb[1].mxu1 }
 0x38a   :  { %570 = vst.msk [vmem:[%s955_s9] sm:$0xff] %vm569_vm6, %v546_v35 }
 0x38b   :  { %v550_v38 = vpop.f32.mrb[2].mxu1 }
 0x38c   :  { %v551_v39 = vadd.f32 %v550_v38, %v447_v37  ;;  %v686_v40 = vpop.f32.mrb[3].mxu1 }
 0x38e   :  { %571 = vst.msk [vmem:[%s955_s9 + $0x8] sm:$0xff] %vm569_vm6, %v551_v39 }
 0x38f   :  { %v555_v42 = vpop.f32.mrb[4].mxu1 }
 0x390   :  { %v556_v43 = vadd.f32 %v555_v42, %v452_v41  ;;  %v689_v44 = vpop.f32.mrb[5].mxu1 }
 0x392   :  { %572 = vst.msk [vmem:[%s955_s9 + $0x10] sm:$0xff] %vm569_vm6, %v556_v43 }
 0x393   :  { %v560_v46 = vpop.f32.mrb[6].mxu1 }
 0x394   :  { %v561_v47 = vadd.f32 %v560_v46, %v457_v45  ;;  %v692_v48 = vpop.f32.mrb[7].mxu1 }
 0x396   :  { %573 = vst.msk [vmem:[%s955_s9 + $0x18] sm:$0xff] %vm569_vm6, %v561_v47 }
 0x397   :  { %v565_v50 = vpop.f32.mrb[8].mxu1 }
 0x398   :  { %v566_v51 = vadd.f32 %v565_v50, %v462_v49  ;;  %v695_v52 = vpop.f32.mrb[9].mxu1 }
 0x39a   :  { %575 = vst.msk [vmem:[%s955_s9 + $0x20] sm:$0xf] %vm574_vm7, %v566_v51 }

</bundles_post_ra>
